<compile_context>
chip_gen: v6e
topology: v6e:2x2x1
jax: 0.10.0
libtpu: 0.0.40
codegen_flags: <defaults>
</compile_context>

<pallas_src>
import functools
import math

import jax
import jax.numpy as jnp
from jax.experimental import pallas as pl
from jax.experimental.pallas import tpu as pltpu


_VMEM_LIMIT_BYTES = 32 * 1024 * 1024      # raised scoped-VMEM limit (safe on v5e..v7x)
_TILE_VMEM_BUDGET = 20 * 1024 * 1024      # per-tile budget (headroom for weights etc.)


# ----------------------- pltpu.roll direction self-check ----------------------

_ROLL_MATCHES_JNP = None


def _roll_matches_jnp():
    """True iff pltpu.roll(x, s, ax) == jnp.roll(x, s, ax) (out[i] = in[(i-s) % N]).

    Probed once with a tiny eager pallas_call so the im2col tap shifts are correct
    under either rotate convention (and under interpret mode).  Must be resolved
    outside jit; prepare_kernel_params() calls it eagerly.
    """
    global _ROLL_MATCHES_JNP
    if _ROLL_MATCHES_JNP is None:
        def probe(x_ref, o_ref):
            o_ref[...] = pltpu.roll(x_ref[...], 1, axis=1)
        x = jnp.tile(jnp.arange(128, dtype=jnp.float32)[None, :], (8, 1))
        out = pl.pallas_call(
            probe, out_shape=jax.ShapeDtypeStruct((8, 128), jnp.float32))(x)
        _ROLL_MATCHES_JNP = bool(out[0, 0] == 127.0)
    return _ROLL_MATCHES_JNP


# ------------------------- in-kernel helpers (shared) -------------------------

def _rowcol(H, W, L):
    """Per-lane row / column index of each pixel (lane axis = n*H*W + i*W + j)."""
    lane = jax.lax.broadcasted_iota(jnp.int32, (1, L), 1)
    pix = lane % (H * W)
    return pix // W, pix % W


def _tap_masks(row, col, H, W):
    """List of 9 border masks (1, L) f32 (None for the always-valid centre tap)."""
    masks = []
    for k in range(9):
        dy, dx = divmod(k, 3)
        conds = []
        if dy == 0:
            conds.append(row >= 1)
        if dy == 2:
            conds.append(row <= H - 2)
        if dx == 0:
            conds.append(col >= 1)
        if dx == 2:
            conds.append(col <= W - 2)
        if not conds:
            masks.append(None)
        else:
            m = conds[0]
            for c in conds[1:]:
                m = jnp.logical_and(m, c)
            masks.append(m.astype(jnp.float32))
    return masks


def _emit_im2col(col_ref, a, base, masks, W, roll_jnp):
    """Write the 9 shifted+masked copies of `a` (C, L) into col_ref[base:base+9C].

    Row layout: base + k*C + c with k = dy*3 + dx (tap index), matching the
    host-side weight packing.  Shifts are cyclic lane rotations (XLU) + border
    masks, so no padded copy, no strided relayout, no extra HBM pass.  Wraparound
    across image boundaries only occurs where the border masks already zero the
    tap, so whole-image lane tiles stay exact.
    """
    C, L = a.shape
    for k in range(9):
        dy, dx = divmod(k, 3)
        off = (dy - 1) * W + (dx - 1)            # want t[p] = a[p + off]
        if off == 0:
            t = a                                 # centre tap: no roll needed
        else:
            shift = (-off) % L if roll_jnp else off % L   # non-negative shift
            t = pltpu.roll(a, shift, axis=1)
        if masks[k] is not None:
            t = t * masks[k]
        col_ref[base + k * C: base + (k + 1) * C, :] = t.astype(col_ref.dtype)


def _imgs_per_tile(n_imgs, img_lanes, bytes_per_lane):
    """Smallest whole-image lane tile that is 128-lane aligned (max grid steps)."""
    for d in range(1, n_imgs + 1):
        if n_imgs % d == 0 and (d * img_lanes) % 128 == 0:
            assert d * img_lanes * bytes_per_lane <= _TILE_VMEM_BUDGET, (
                "lane tile too large for VMEM; TODO(synk): row-strip tiles with "
                "an explicit +/-W lane halo for large single images")
            return d
    return n_imgs            # no 128-aligned grouping: single full-extent tile


# --------------------------- single fused-conv kernel -------------------------

def _conv_kernel(x_ref, w_ref, b_ref, *rest, H, W, neg_slope, has_res,
                 res_scale, clamp, roll_jnp):
    """3x3 SAME conv on a (Cin, lane_tile) block, fused bias/LeakyReLU/residual/clamp."""
    if has_res:
        res_ref, o_ref, col_ref = rest
    else:
        res_ref = None
        o_ref, col_ref = rest
    L = x_ref.shape[1]
    row, col = _rowcol(H, W, L)
    masks = _tap_masks(row, col, H, W)               # hoisted: built once per tile
    _emit_im2col(col_ref, x_ref[...], 0, masks, W, roll_jnp)
    acc = jnp.dot(w_ref[...], col_ref[...],          # (Cout, 9Cin) @ (9Cin, L)
                  preferred_element_type=jnp.float32)
    acc = acc + b_ref[...]                           # (Cout, 1) lane-broadcast
    if neg_slope is not None:
        acc = jnp.where(acc >= 0.0, acc, acc * neg_slope)
    if has_res:
        acc = acc * res_scale + res_ref[...]
    if clamp:
        acc = jnp.clip(acc, 0.0, 1.0)
    o_ref[...] = acc


def conv_pallas(x, wb, H, W, *, neg_slope=None, res=None, res_scale=None,
                clamp=False):
    """x: (Cin, N*H*W) f32; wb = (w_mat (Cout, 9*Cin) f32, bias (Cout, 1) f32)."""
    w_mat, b = wb
    Cin, L = x.shape
    Cout = w_mat.shape[0]
    img = H * W
    # approx bytes of VMEM per lane: f32 col scratch + double-buffered in/out (+res)
    bpl = 4 * (9 * Cin + 2 * Cin + 3 * Cout + (2 * Cout if res is not None else 0))
    tile = _imgs_per_tile(L // img, img, bpl) * img
    grid = (L // tile,)

    kernel = functools.partial(
        _conv_kernel, H=H, W=W, neg_slope=neg_slope, has_res=res is not None,
        res_scale=None if res is None else float(res_scale), clamp=clamp,
        roll_jnp=_roll_matches_jnp())
    in_specs = [pl.BlockSpec((Cin, tile), lambda i: (0, i)),
                pl.BlockSpec(w_mat.shape, lambda i: (0, 0)),     # resident weights
                pl.BlockSpec(b.shape, lambda i: (0, 0))]
    args = [x, w_mat, b]
    if res is not None:
        in_specs.append(pl.BlockSpec((Cout, tile), lambda i: (0, i)))
        args.append(res)

    flops = int(2 * Cout * 9 * Cin * L)
    bytes_acc = int(4 * ((Cin + Cout + (Cout if res is not None else 0)) * L
                         + w_mat.size + b.size))
    return pl.pallas_call(
        kernel,
        grid=grid,
        in_specs=in_specs,
        out_specs=pl.BlockSpec((Cout, tile), lambda i: (0, i)),
        out_shape=jax.ShapeDtypeStruct((Cout, L), jnp.float32),
        scratch_shapes=[pltpu.VMEM((9 * Cin, tile), jnp.float32)],
        compiler_params=pltpu.CompilerParams(
            dimension_semantics=("parallel",),
            vmem_limit_bytes=_VMEM_LIMIT_BYTES),
        cost_estimate=pl.CostEstimate(flops=flops, transcendentals=0,
                                      bytes_accessed=bytes_acc),
    )(*args)


# --------------------------- fused whole-RRDB kernel --------------------------

def _rrdb_kernel(x_ref, w1_ref, w2_ref, w3_ref, w4_ref, w5_ref, b_ref,
                 o_ref, col_ref, *, nf, H, W, roll_jnp):
    """One full RRDB on a lane tile: 3 dense blocks (15 convs) + residuals, in VMEM.

    col_ref is a (45*nf, tile) bf16 im2col scratch.  Source m (x, x1..x4) owns
    rows [m*9*nf, (m+1)*9*nf); conv_l is a single MXU matmul over rows [0, 9*l*nf)
    (weights are pre-packed source-major on the host).
    """
    L = x_ref.shape[1]
    row, col = _rowcol(H, W, L)
    masks = _tap_masks(row, col, H, W)       # hoisted: built once, reused by 15 convs
    w_refs = (w1_ref, w2_ref, w3_ref, w4_ref, w5_ref)
    x_cur = x_ref[...]
    for r in range(3):                                   # 3 RDBs per RRDB
        feat = x_cur
        _emit_im2col(col_ref, feat, 0, masks, W, roll_jnp)
        for l in range(4):                               # conv1..conv4 (+ lrelu 0.2)
            kdim = 9 * (l + 1) * nf
            acc = jnp.dot(w_refs[l][r], col_ref[0:kdim, :],
                          preferred_element_type=jnp.float32)
            acc = acc + b_ref[r * 5 + l]
            acc = jnp.where(acc >= 0.0, acc, acc * 0.2)
            _emit_im2col(col_ref, acc, kdim, masks, W, roll_jnp)
        acc = jnp.dot(w_refs[4][r], col_ref[...],        # conv5 over all 5 sources
                      preferred_element_type=jnp.float32)
        acc = acc + b_ref[r * 5 + 4]
        x_cur = acc * 0.2 + feat                         # RDB residual (f32)
    o_ref[...] = x_cur * 0.2 + x_ref[...]                # outer RRDB residual (f32)


def rrdb_pallas(x, blk, *, H, W):
    """x: (nf, N*H*W) f32; blk = (w1..w5 bf16 stacks over 3 RDBs, f32 bias stack)."""
    w1, w2, w3, w4, w5, b = blk
    nf, L = x.shape
    img = H * W
    # approx bytes of VMEM per lane: bf16 col scratch + f32 in/out buffers + live vals
    bpl = 2 * 45 * nf + 4 * (2 * nf + 2 * nf + 3 * nf)
    tile = _imgs_per_tile(L // img, img, bpl) * img
    grid = (L // tile,)

    kernel = functools.partial(_rrdb_kernel, nf=nf, H=H, W=W,
                               roll_jnp=_roll_matches_jnp())
    w_specs = [pl.BlockSpec(w.shape, lambda i: (0, 0, 0))      # resident per call
               for w in (w1, w2, w3, w4, w5)]
    # conv_l has Cout=nf, K=9*l*nf; 3 RDBs per RRDB.
    flops = int(2 * 3 * sum(nf * 9 * l * nf for l in range(1, 6)) * L)
    wbytes = 2 * sum(int(w.size) for w in (w1, w2, w3, w4, w5)) + 4 * int(b.size)
    bytes_acc = int(4 * 2 * nf * L + wbytes)
    return pl.pallas_call(
        kernel,
        grid=grid,
        in_specs=[pl.BlockSpec((nf, tile), lambda i: (0, i))] + w_specs
                 + [pl.BlockSpec(b.shape, lambda i: (0, 0, 0))],
        out_specs=pl.BlockSpec((nf, tile), lambda i: (0, i)),
        out_shape=jax.ShapeDtypeStruct((nf, L), jnp.float32),
        scratch_shapes=[pltpu.VMEM((45 * nf, tile), jnp.bfloat16)],
        compiler_params=pltpu.CompilerParams(
            dimension_semantics=("parallel",),
            vmem_limit_bytes=_VMEM_LIMIT_BYTES),
        cost_estimate=pl.CostEstimate(flops=flops, transcendentals=0,
                                      bytes_accessed=bytes_acc),
    )(x, w1, w2, w3, w4, w5, b)


# ------------------------------- plain-JAX glue -------------------------------

def _pixel_shuffle_flat(y, N, H, W):
    """PixelShuffle(2) on the (C, N*H*W) layout: (4c, N*H*W) -> (c, N*2H*2W)."""
    C4 = y.shape[0]
    c = C4 // 4
    y = y.reshape(c, 2, 2, N, H, W)                      # (c, a, b, n, h, w)
    y = jnp.transpose(y, (0, 3, 4, 1, 5, 2))             # (c, n, h, a, w, b)
    return y.reshape(c, N * (2 * H) * (2 * W))


def forward_pallas(x_nchw, kp):
    """Full GeneratorRRDB_SR forward on NCHW input, using the fused Pallas kernels."""
    N, Cin, H, W = x_nchw.shape
    cin_pad = kp['conv_first'][0].shape[1] // 9
    # NCHW -> internal lane-dense (C, N*H*W); pad channels once to a multiple of 8.
    t = jnp.transpose(x_nchw, (1, 0, 2, 3)).reshape(Cin, N * H * W)
    t = jnp.pad(t, ((0, cin_pad - Cin), (0, 0)))

    fea = conv_pallas(t, kp['conv_first'], H, W)
    trunk = fea
    for blk in kp['rrdb']:
        trunk = rrdb_pallas(trunk, blk, H=H, W=W)
    fea = conv_pallas(trunk, kp['trunk_conv'], H, W, res=fea, res_scale=1.0)

    h, w = H, W
    for up in kp['upsample']:
        y = conv_pallas(fea, up, h, w, neg_slope=0.01)   # nn.LeakyReLU() default
        # TODO(synk): fuse the PixelShuffle lane interleave into the conv output
        # store (strided lane scatter) instead of this plain-JAX transpose glue.
        fea = _pixel_shuffle_flat(y, N, h, w)
        h, w = 2 * h, 2 * w

    fea = conv_pallas(fea, kp['HRconv'], h, w, neg_slope=0.2)
    out = conv_pallas(fea, kp['conv_last'], h, w, clamp=True)
    cout = out.shape[0]
    return jnp.transpose(out.reshape(cout, N, h, w), (1, 0, 2, 3))


# --------------------- host-side weight packing for the kernels ---------------

def prepare_kernel_params(params, *, nf):
    """Re-pack raw (3,3,Cin,Cout)/(Cout,) params into the kernel layouts (once,
    on the host, outside jit).  Also resolves the pltpu.roll direction probe so
    it is never attempted under tracing."""
    _roll_matches_jnp()

    def plain(wb, pad_cin_to=None):
        w, b = wb
        cin = w.shape[2]
        if pad_cin_to is not None and pad_cin_to > cin:
            w = jnp.pad(w, ((0, 0), (0, 0), (0, pad_cin_to - cin), (0, 0)))
        cin_p, cout = w.shape[2], w.shape[3]
        wm = jnp.transpose(w.reshape(9 * cin_p, cout))   # (Cout, 9*Cin), K=(tap,chan)
        return wm, b.reshape(cout, 1)

    def rdb_wmat(w):
        # Split Cin into per-source chunks of nf (dense-concat order: x, x1, ..)
        # so K ends up source-major / tap / channel — matching the col scratch.
        cin, cout = w.shape[2], w.shape[3]
        nsrc = cin // nf
        chunks = [w[:, :, m * nf:(m + 1) * nf, :].reshape(9 * nf, cout)
                  for m in range(nsrc)]
        return jnp.transpose(jnp.concatenate(chunks, axis=0))  # (Cout, 9*nsrc*nf)

    cin0 = params['conv_first'][0].shape[2]
    cin_pad = -(-cin0 // 8) * 8      # pad input-channel dim to a sublane multiple

    kp = {'conv_first': plain(params['conv_first'], pad_cin_to=cin_pad)}
    rrdbs = []
    for blk in params['trunk']:                # blk: 3 RDBs x 5 (w, b)
        wl = [[] for _ in range(5)]
        bl = []
        for rdb in blk:
            for l, (w, b) in enumerate(rdb):
                wl[l].append(rdb_wmat(w))
                bl.append(b.reshape(nf, 1))
        # bf16 trunk weights (MXU-native, half the VMEM); f32 biases / residual path.
        rrdbs.append(tuple(jnp.stack(ws, axis=0).astype(jnp.bfloat16) for ws in wl)
                     + (jnp.stack(bl, axis=0),))
    kp['rrdb'] = rrdbs
    kp['trunk_conv'] = plain(params['trunk_conv'])
    kp['upsample'] = [plain(u) for u in params['upsample']]
    kp['HRconv'] = plain(params['HRconv'])
    kp['conv_last'] = plain(params['conv_last'])
    return kp


# ------------------------- pure-JAX (XLA conv) reference ----------------------

def conv3x3_ref(x, w, b, *, neg_slope=None, res=None, res_scale=None, clamp=False):
    y = jax.lax.conv_general_dilated(
        x, w, (1, 1), 'SAME',
        dimension_numbers=('NHWC', 'HWIO', 'NHWC'),
        precision=jax.lax.Precision.HIGHEST)
    y = y + b.reshape(1, 1, 1, -1)
    if neg_slope is not None:
        y = jnp.where(y >= 0.0, y, y * neg_slope)
    if res is not None:
        y = y * (1.0 if res_scale is None else res_scale) + res
    if clamp:
        y = jnp.clip(y, 0.0, 1.0)
    return y


def _pixel_shuffle2_nhwc(x):
    N, H, W, C = x.shape
    c = C // 4
    x = x.reshape(N, H, W, c, 2, 2)
    x = jnp.transpose(x, (0, 1, 4, 2, 5, 3))
    return x.reshape(N, H * 2, W * 2, c)


def _rdb_forward_ref(x, convs):
    x1 = conv3x3_ref(x, *convs[0], neg_slope=0.2)
    x2 = conv3x3_ref(jnp.concatenate([x, x1], -1), *convs[1], neg_slope=0.2)
    x3 = conv3x3_ref(jnp.concatenate([x, x1, x2], -1), *convs[2], neg_slope=0.2)
    x4 = conv3x3_ref(jnp.concatenate([x, x1, x2, x3], -1), *convs[3], neg_slope=0.2)
    return conv3x3_ref(jnp.concatenate([x, x1, x2, x3, x4], -1), *convs[4],
                       res=x, res_scale=0.2)


def forward_ref(x, params):
    fea = conv3x3_ref(x, *params['conv_first'])
    t = fea
    for blk in params['trunk']:
        rrdb_in = t
        for rdb in blk:
            t = _rdb_forward_ref(t, rdb)
        t = t * 0.2 + rrdb_in
    fea = conv3x3_ref(t, *params['trunk_conv'], res=fea, res_scale=1.0)
    for up in params['upsample']:
        fea = _pixel_shuffle2_nhwc(conv3x3_ref(fea, *up, neg_slope=0.01))
    fea = conv3x3_ref(fea, *params['HRconv'], neg_slope=0.2)
    return conv3x3_ref(fea, *params['conv_last'], clamp=True)


# ------------------------------- parameter init -------------------------------

def init_conv(key, cin, cout, last=False):
    kw, kb = jax.random.split(key)
    if last:
        # conv_last: uniform(-stdv, stdv + 0.01*stdv), stdv = 1/sqrt(Cin)
        s = 1.0 / math.sqrt(cin)
        lo, hi = -s, s + 0.01 * s
    else:
        s = 1.0 / math.sqrt(cin * 9)
        lo, hi = -s, s
    w = jax.random.uniform(kw, (3, 3, cin, cout), jnp.float32, lo, hi)
    b = jax.random.uniform(kb, (cout,), jnp.float32, lo, hi)
    return w, b


def init_params(key, in_channels, out_channels, nf, num_res_blocks, num_upsample):
    gc = nf  # grow_count_filters = num_filters (per the PyTorch module)
    n_keys = 4 + 15 * num_res_blocks + num_upsample
    keys = iter(jax.random.split(key, n_keys))
    p = {}
    p['conv_first'] = init_conv(next(keys), in_channels, nf)
    trunk = []
    for _ in range(num_res_blocks):
        blk = []
        for _ in range(3):  # 3 RDBs per RRDB
            chans = [(nf, gc), (nf + gc, gc), (nf + 2 * gc, gc),
                     (nf + 3 * gc, gc), (nf + 4 * gc, nf)]
            blk.append([init_conv(next(keys), ci, co) for ci, co in chans])
        trunk.append(blk)
    p['trunk'] = trunk
    p['trunk_conv'] = init_conv(next(keys), nf, nf)
    p['upsample'] = [init_conv(next(keys), nf, nf * 4) for _ in range(num_upsample)]
    p['HRconv'] = init_conv(next(keys), nf, nf)
    p['conv_last'] = init_conv(next(keys), nf, out_channels, last=True)
    return p


# ------------------------------------ main -------------------------------------

if __name__ == "__main__":
    in_channels, out_channels = 3, 3
    num_filters = 16          # nf == gc; multiple of 16 keeps bf16 sublane tiles aligned
    num_res_blocks = 2
    num_upsample = 2
    N, H, W = 2, 16, 16

    key = jax.random.PRNGKey(0)
    k_param, k_x = jax.random.split(key)
    params = init_params(k_param, in_channels, out_channels, num_filters,
                         num_res_blocks, num_upsample)
    x_nchw = jax.random.uniform(k_x, (N, in_channels, H, W), jnp.float32)

    # Packed once on the host, outside jit (also resolves the roll-direction probe).
    kparams = prepare_kernel_params(params, nf=num_filters)

    run_pallas = jax.jit(forward_pallas)
    out = jax.block_until_ready(run_pallas(x_nchw, kparams))

    # Correctness check vs a plain-JAX (XLA conv) reference of the same network.
    x_nhwc = jnp.transpose(x_nchw, (0, 2, 3, 1))
    ref = jnp.transpose(forward_ref(x_nhwc, params), (0, 3, 1, 2))
    ref = jax.block_until_ready(ref)

    scale = 2 ** num_upsample
    assert out.shape == (N, out_channels, H * scale, W * scale), out.shape
    assert out.dtype == jnp.float32
    max_err = float(jnp.max(jnp.abs(out - ref)))
    assert max_err < 2e-3, f"mismatch vs reference: {max_err}"
    print("KERNEL_OK")
</pallas_src>

<mosaic_0001>
module attributes {stable_mosaic.version = 11 : i64} {
  func.func @probe(%arg0: memref<8x128xf32, #tpu.memory_space<vmem>>, %arg1: memref<8x128xf32, #tpu.memory_space<vmem>>) attributes {dimension_semantics = [], scalar_prefetch = 0 : i64, scratch_operands = 0 : i64, tpu.core_type = #tpu.core_type<tc>} {
    %c0 = arith.constant 0 : index
    %c0_0 = arith.constant 0 : index
    %0 = vector.load %arg0[%c0, %c0_0] : memref<8x128xf32, #tpu.memory_space<vmem>>, vector<8x128xf32>
    %c1_i32 = arith.constant 1 : i32
    %1 = tpu.dynamic_rotate %0 by %c1_i32 dim 1 : vector<8x128xf32>, i32 -> vector<8x128xf32>
    %c0_1 = arith.constant 0 : index
    %c0_2 = arith.constant 0 : index
    %2 = vector.load %arg1[%c0_1, %c0_2] : memref<8x128xf32, #tpu.memory_space<vmem>>, vector<8x128xf32>
    tpu.vector_store %arg1[%c0_1, %c0_2], %1 {strides = array<i32>} : memref<8x128xf32, #tpu.memory_space<vmem>>, vector<8x128xf32>,
    return
  }
}

</mosaic_0001>

<bundles_post_ra>
// kernel: tpu_custom_call.1
= control target key start
LH: loop header
LB: loop body
LE: loop exit
PB: predicated region body
PF: predicated region fallthrough
CT: control target
= control target key end

     0   :  { %6 = vsyncpa [#allocation3], 0  ;;  %s106_s0 = inlined_call_operand.hbm [shape: f32[8,128], index: 0, kind: input, shape index: {}]   ;;  %s107_s1 = inlined_call_operand.hbm [shape: f32[8,128], index: 1, kind: output, shape index: {}]  }
   0x1   :  { %7 = vsyncpa [#allocation4], 0  ;;  %s87_s6 = smov [#allocation2]  }
   0x2   :  { %s14_s7 = sshll.u32 %s87_s6, 4  ;;  %s15_s7 = int_to_ptr.vmem [resolvable:$true] %s14_s7 }
   0x3   :  { %s51_s8 = scalar_lea.vmem %s15_s7, 128  ;;  %p56_p1 = scmp.lt.s32.totalorder %s15_s7, %s15_s7 }
   0x4   :  { %p52_p0 = scmp.ne.s32.totalorder %s15_s7, %s51_s8  ;;  %p57_p2 = scmp.lt.s32.totalorder %s51_s8, %s51_s8 }
   0x6   :  { %p58_p3 = por %p57_p2, %p56_p1 }
   0x8   :  { %p59_p4 = pnand %p58_p3, %p52_p0 }
   0xa   :  { %62 = shalt.err (!%p59_p4)
}
   0xb   :  { %17 = dma.hbm_to_vmem [thread:$0]  %s106_s0, 128, %s15_s7, [#allocation3]  }
   0xc   :  { %83 = dma.done.wait [#allocation3], 128  }
   0xd   :  { %84 = vsyncadd [#allocation3], 4294967168  ;;  %v21_v0 = vld [vmem:[#allocation2] sm:$0xff]  ;;  %s88_s11 = smov 1   ;;  %s89_s12 = smov [#allocation5]  }
   0xe   :  { %22 = vrot.lane.b32.xlu0 %v21_v0, %s88_s11  ;;  %s31_s13 = sshll.u32 %s89_s12, 4  ;;  %s32_s13 = int_to_ptr.vmem [resolvable:$true] %s31_s13 }
   0xf   :  { %s63_s14 = scalar_lea.vmem %s32_s13, 128  ;;  %p68_p6 = scmp.lt.s32.totalorder %s32_s13, %s32_s13 }
  0x10   :  { %p64_p5 = scmp.ne.s32.totalorder %s32_s13, %s63_s14  ;;  %p69_p7 = scmp.lt.s32.totalorder %s63_s14, %s63_s14 }
  0x12   :  { %p70_p8 = por %p69_p7, %p68_p6 }
  0x14   :  { %p71_p9 = pnand %p70_p8, %p64_p5 }
  0x80   :  { %v23_v1 = vpop.permute.xlu0 %22 }
  0x81   :  { %24 = vst [vmem:[#allocation5] sm:$0xff] %v23_v1 }
  0x82   :  { %74 = shalt.err (!%p71_p9)
}
  0x83   :  { %34 = dma.vmem_to_hbm [thread:$0]  %s32_s13, 128, %s107_s1, [#allocation4]  }
  0x84   :  { %85 = dma.done.wait [#allocation4], 128  }
  0x85   :  { %86 = vsyncadd [#allocation4], 4294967168 }
  0x86   :  { %38 = vsyncpa [#allocation3], 1 }
  0x87   :  { %39 = vsyncpa [#allocation4], 1 }

</bundles_post_ra>
